<compile_context>
chip_gen: v5e
topology: v5e:2x2
jax: 0.10.0
libtpu: 0.0.40
codegen_flags: <defaults>
</compile_context>

<pallas_src>
import math
import numpy as np
import jax
import jax.numpy as jnp
from jax import lax
from jax.experimental import pallas as pl
from jax.experimental.pallas import tpu as pltpu


def _conv_out(size, k, s, p):
    return (size + 2 * p - k) // s + 1


# ----------------------------- Pallas kernel --------------------------------

def _fused_kernel(w1m_ref, p1t_ref, w2big_ref, b2_ref, o_ref):
    # conv1 (+ folded bias) as one MXU matmul in transposed im2col layout:
    #   (8, K1p) @ (K1p, M1) -> (8, M1); pixels lane-dense, channels on sublanes.
    h1 = jnp.dot(w1m_ref[...], p1t_ref[...], preferred_element_type=jnp.float32)
    # Channel max = single sublane reduce (XLU slot, not VPU); padded channel rows are -1e30
    # (sentinel folded into the bias column of w1m) so reducing over all 8 sublanes is safe.
    m = jnp.max(h1, axis=0, keepdims=True)                        # (1, M1)
    v5 = jnp.where(m > 0, m, m * -0.1)
    # conv2 folded into one (M1, Qp) matrix (Cin-summed, block-diag over batch, lane-padded to 128).
    o = jnp.dot(v5, w2big_ref[...], preferred_element_type=jnp.float32) + b2_ref[...]
    o_ref[...] = o.astype(o_ref.dtype)


# ------------------------- parameter-only precompute ------------------------

def precompute(params, input_shape):
    """All parameter-only prep. Runs ONCE at init (numpy); nothing here re-executes per forward."""
    w1 = np.asarray(params["w1"]); b1 = np.asarray(params["b1"])
    w2 = np.asarray(params["w2"]); b2 = np.asarray(params["b2"])
    N, Cin, H, W = input_shape
    Cout1, _, kh, kw = w1.shape
    stride, pad = 2, 1
    Ho1, Wo1 = _conv_out(H, kh, stride, pad), _conv_out(W, kw, stride, pad)
    M1 = N * Ho1 * Wo1                                            # 2*8*8 = 128 (lane-dense pixel axis)

    # conv1 weight matrix (8 sublanes x K padded to 32). Bias folded at column K1 (runtime patch
    # matrix gets a ones-row there); padded sublane rows get a -1e30 sentinel so the in-kernel
    # full-sublane max can never pick them.
    K1 = Cin * kh * kw
    K1p = ((K1 + 1 + 7) // 8) * 8                                 # 27 + ones-row -> 32
    Cp = 8
    w1m = np.zeros((Cp, K1p), np.float32)
    w1m[:Cout1, :K1] = w1.reshape(Cout1, K1)
    w1m[:Cout1, K1] = b1
    w1m[Cout1:, K1] = -1e30

    # conv2 folded over the conv1 pixel grid. The 1-channel max map feeding a 3-in-channel conv is
    # interpreted as broadcast across Cin == summing w2 over its Cin axis.
    # TODO(synk): the original PyTorch module would raise a channel-mismatch at runtime here; the
    # broadcast interpretation is the assumed spec (matches _ref_forward).
    Cout2 = w2.shape[0]
    Ho2, Wo2 = _conv_out(Ho1, kh, stride, pad), _conv_out(Wo1, kw, stride, pad)
    Q = N * Cout2 * Ho2 * Wo2
    Qp = ((Q + 127) // 128) * 128                                 # 96 -> 128 (unmasked lane-dense store)
    w2s = w2.sum(axis=1)                                          # (Cout2, kh, kw)
    blk = np.zeros((Ho1 * Wo1, Cout2 * Ho2 * Wo2), np.float32)
    for r in range(Ho1):
        for s in range(Wo1):
            for c in range(Cout2):
                for u in range(Ho2):
                    for v in range(Wo2):
                        i, j = r - stride * u + pad, s - stride * v + pad
                        if 0 <= i < kh and 0 <= j < kw:
                            blk[r * Wo1 + s, (c * Ho2 + u) * Wo2 + v] = w2s[c, i, j]
    # Block-diagonal over the batch (pixels of image n only feed outputs of image n).
    # TODO(synk): O(N^2) and mostly zeros -- if N grows, make batch a grid axis reusing `blk` via an
    # index_map instead of materializing the block diagonal (per v7x VMEM review note). Fine at N=2.
    w2big = np.zeros((M1, Qp), np.float32)
    for n in range(N):
        w2big[n * Ho1 * Wo1:(n + 1) * Ho1 * Wo1,
              n * Cout2 * Ho2 * Wo2:(n + 1) * Cout2 * Ho2 * Wo2] = blk
    b2row = np.zeros((1, Qp), np.float32)
    b2row[0, :Q] = np.tile(np.repeat(b2, Ho2 * Wo2), N)

    return {
        "w1m": jnp.asarray(w1m), "w2big": jnp.asarray(w2big), "b2row": jnp.asarray(b2row),
        "K1p": K1p, "M1": M1, "Q": Q, "Qp": Qp, "Cout2": Cout2, "Ho2": Ho2, "Wo2": Wo2,
    }


# --------------------------------- forward ----------------------------------

def model_forward(x, prep):
    N = x.shape[0]
    # Runtime-only prep: one fused patches op (+ transpose/reshape + one concat for the folded-bias
    # ones-row). Channel order of the patch rows is (cin, i, j), matching w1.reshape(Cout, Cin*kh*kw).
    patches = lax.conv_general_dilated_patches(
        x, filter_shape=(3, 3), window_strides=(2, 2), padding=((1, 1), (1, 1)),
        dimension_numbers=("NCHW", "OIHW", "NCHW"),
        precision=lax.Precision.HIGHEST)                          # (N, Cin*kh*kw, Ho1, Wo1)
    K1, Ho1, Wo1 = patches.shape[1], patches.shape[2], patches.shape[3]
    M1 = N * Ho1 * Wo1
    K1p = prep["K1p"]
    p1t = jnp.transpose(patches, (1, 0, 2, 3)).reshape(K1, M1)    # cols = (n, oh, ow), lane-dense
    p1t = jnp.concatenate(
        [p1t, jnp.ones((1, M1), p1t.dtype), jnp.zeros((K1p - K1 - 1, M1), p1t.dtype)], axis=0)

    Qp = prep["Qp"]
    flops = 2 * 8 * K1p * M1 + 2 * M1 * Qp + 4 * M1
    bytes_accessed = 4 * (int(prep["w1m"].size) + K1p * M1 + int(prep["w2big"].size) + 2 * Qp)

    out = pl.pallas_call(
        _fused_kernel,
        out_shape=jax.ShapeDtypeStruct((1, Qp), x.dtype),
        in_specs=[pl.BlockSpec(memory_space=pltpu.MemorySpace.VMEM)] * 4,
        out_specs=pl.BlockSpec(memory_space=pltpu.MemorySpace.VMEM),
        cost_estimate=pl.CostEstimate(flops=int(flops), transcendentals=0,
                                      bytes_accessed=int(bytes_accessed)),
    )(prep["w1m"], p1t, prep["w2big"], prep["b2row"])

    # (1, Qp) row is NCHW-ordered in its first Q lanes -> static slice + metadata-only reshape.
    return out[:, :prep["Q"]].reshape(N, prep["Cout2"], prep["Ho2"], prep["Wo2"])


# ----------------------------- reference / setup -----------------------------

def _ref_forward(x, params):
    dn = ("NCHW", "OIHW", "NCHW")
    hp = lax.Precision.HIGHEST
    v1 = lax.conv_general_dilated(x, params["w1"], (2, 2), ((1, 1), (1, 1)),
                                  dimension_numbers=dn, precision=hp) \
         + params["b1"].reshape(1, -1, 1, 1)
    v2 = jnp.max(v1, axis=1, keepdims=True)
    v5 = jnp.where(v2 > 0, v2, v2 * -0.1)
    v5b = jnp.broadcast_to(v5, (v5.shape[0], params["w2"].shape[1], v5.shape[2], v5.shape[3]))
    return lax.conv_general_dilated(v5b, params["w2"], (2, 2), ((1, 1), (1, 1)),
                                    dimension_numbers=dn, precision=hp) \
           + params["b2"].reshape(1, -1, 1, 1)


def init_params(key):
    k1, k2, k3, k4 = jax.random.split(key, 4)
    fan_in = 3 * 3 * 3
    bound = 1.0 / math.sqrt(fan_in)
    w1 = jax.random.uniform(k1, (3, 3, 3, 3), jnp.float32, -bound, bound)
    b1 = jax.random.uniform(k2, (3,), jnp.float32, -bound, bound)
    w2 = jax.random.uniform(k3, (3, 3, 3, 3), jnp.float32, -bound, bound)
    b2 = jax.random.uniform(k4, (3,), jnp.float32, -bound, bound)
    return {"w1": w1, "b1": b1, "w2": w2, "b2": b2}


if __name__ == "__main__":
    key = jax.random.PRNGKey(0)
    pkey, xkey = jax.random.split(key)
    params = init_params(pkey)
    x = jax.random.normal(xkey, (2, 3, 16, 16), jnp.float32)      # NCHW input

    prep = precompute(params, x.shape)                            # hoisted: built once, not per call
    fwd = jax.jit(lambda xx: model_forward(xx, prep))

    out = jax.block_until_ready(fwd(x))
    assert out.shape == (2, 3, 4, 4), out.shape

    ref = _ref_forward(x, params)
    err = float(jnp.max(jnp.abs(out - ref)))
    # Tightened from 1e-2. Not all the way to 1e-5: the MXU may run f32 matmuls as reduced-precision
    # passes at default precision; layout/indexing regressions produce O(0.1) errors, so this still
    # catches real bugs.
    assert jnp.allclose(out, ref, atol=2e-3, rtol=2e-3), err

    print("KERNEL_OK")
</pallas_src>

<mosaic_0001>
module attributes {stable_mosaic.version = 11 : i64} {
  func.func @_fused_kernel(%arg0: memref<8x32xf32, #tpu.memory_space<vmem>>, %arg1: memref<32x128xf32, #tpu.memory_space<vmem>>, %arg2: memref<128x128xf32, #tpu.memory_space<vmem>>, %arg3: memref<1x128xf32, #tpu.memory_space<vmem>>, %arg4: memref<1x128xf32, #tpu.memory_space<vmem>>) attributes {dimension_semantics = [], scalar_prefetch = 0 : i64, scratch_operands = 0 : i64, tpu.core_type = #tpu.core_type<tc>} {
    %c0 = arith.constant 0 : index
    %c0_0 = arith.constant 0 : index
    %0 = vector.load %arg0[%c0, %c0_0] : memref<8x32xf32, #tpu.memory_space<vmem>>, vector<8x32xf32>
    %c0_1 = arith.constant 0 : index
    %c0_2 = arith.constant 0 : index
    %1 = vector.load %arg1[%c0_1, %c0_2] : memref<32x128xf32, #tpu.memory_space<vmem>>, vector<32x128xf32>
    %cst = arith.constant dense<0.000000e+00> : vector<8x128xf32>
    %2 = tpu.matmul %0, %1, %cst {dimension_numbers = #tpu.dot_dimension_numbers<[1], [0], [0], [1], [0, 0, 1, 1], [], []>} : vector<8x32xf32>, vector<32x128xf32>, vector<8x128xf32> -> vector<8x128xf32>
    %cst_3 = arith.constant dense<0xFF800000> : vector<128xf32>
    %3 = vector.multi_reduction <maximumf>, %2, %cst_3 [0] : vector<8x128xf32> to vector<128xf32>
    %4 = vector.shape_cast %3 : vector<128xf32> to vector<1x128xf32>
    %cst_4 = arith.constant 0.000000e+00 : f32
    %5 = vector.broadcast %cst_4 : f32 to vector<1x128xf32>
    %6 = arith.cmpf ogt, %4, %5 : vector<1x128xf32>
    %cst_5 = arith.constant -1.000000e-01 : f32
    %7 = vector.broadcast %cst_5 : f32 to vector<1x128xf32>
    %8 = arith.mulf %4, %7 : vector<1x128xf32>
    %9 = arith.select %6, %4, %8 : vector<1x128xi1>, vector<1x128xf32>
    %c0_6 = arith.constant 0 : index
    %c0_7 = arith.constant 0 : index
    %10 = vector.load %arg2[%c0_6, %c0_7] : memref<128x128xf32, #tpu.memory_space<vmem>>, vector<128x128xf32>
    %cst_8 = arith.constant dense<0.000000e+00> : vector<1x128xf32>
    %11 = tpu.matmul %9, %10, %cst_8 {dimension_numbers = #tpu.dot_dimension_numbers<[1], [0], [0], [1], [0, 0, 1, 1], [], []>} : vector<1x128xf32>, vector<128x128xf32>, vector<1x128xf32> -> vector<1x128xf32>
    %c0_9 = arith.constant 0 : index
    %c0_10 = arith.constant 0 : index
    %12 = vector.load %arg3[%c0_9, %c0_10] : memref<1x128xf32, #tpu.memory_space<vmem>>, vector<1x128xf32>
    %13 = arith.addf %11, %12 : vector<1x128xf32>
    %c0_11 = arith.constant 0 : index
    %c0_12 = arith.constant 0 : index
    %14 = vector.load %arg4[%c0_11, %c0_12] : memref<1x128xf32, #tpu.memory_space<vmem>>, vector<1x128xf32>
    tpu.vector_store %arg4[%c0_11, %c0_12], %13 {strides = array<i32>} : memref<1x128xf32, #tpu.memory_space<vmem>>, vector<1x128xf32>,
    return
  }
}

</mosaic_0001>

<bundles_post_ra>
// kernel: _lambda_.1
= control target key start
LH: loop header
LB: loop body
LE: loop exit
PB: predicated region body
PF: predicated region fallthrough
CT: control target
= control target key end

     0   :  { %vm22_vm0 = vcmask 261120   ;;  %s192_s1 = inlined_call_operand.vmem [shape: f32[32,128], index: 1, kind: input, shape index: {}]   ;;  %s193_s2 = inlined_call_operand.vmem [shape: f32[128,128], index: 2, kind: input, shape index: {}]   ;;  %s194_s0 = inlined_call_operand.vmem [shape: f32[8,32], index: 0, kind: input, shape index: {}]   ;;  %s195_s3 = inlined_call_operand.vmem [shape: f32[1,128], index: 3, kind: input, shape index: {}]   ;;  %s196_s4 = inlined_call_operand.vmem [shape: f32[1,128], index: 4, kind: output, shape index: {}]  }
   0x1   :  { %v21_v0 = vld [vmem:[%s192_s1 + $0x18] sm:$0xff]  ;;  %v20_v1 = vld [vmem:[%s192_s1 + $0x10] sm:$0xff]  ;;  %v19_v3 = vld [vmem:[%s192_s1 + $0x8] sm:$0xff] }
   0x2   :  { %38 = vmatpush.msra.mxu0 %v21_v0  ;;  %v70_v2 = vld [vmem:[%s193_s2 + $0x78] sm:$0xff]  ;;  %v69_v4 = vld [vmem:[%s193_s2 + $0x70] sm:$0xff]  ;;  %v68_v5 = vld [vmem:[%s193_s2 + $0x68] sm:$0xff] }
   0x3   :  { %72 = vmatpush.msra.mxu1 %v70_v2  ;;  %v18_v6 = vld [vmem:[%s192_s1] sm:$0xff]  ;;  %v66_v9 = vld [vmem:[%s193_s2 + $0x58] sm:$0xff]  ;;  %v65_v10 = vld [vmem:[%s193_s2 + $0x50] sm:$0xff] }
   0x4   :  { %39 = vmatpush.msra.mxu0 %v20_v1  ;;  %v17_v7 = vld [vmem:[%s194_s0] sm:$0xff]  ;;  %v64_v11 = vld [vmem:[%s193_s2 + $0x48] sm:$0xff]  ;;  %v62_v13 = vld [vmem:[%s193_s2 + $0x38] sm:$0xff] }
   0x5   :  { %73 = vmatpush.msra.mxu1 %v69_v4  ;;  %v67_v8 = vld [vmem:[%s193_s2 + $0x60] sm:$0xff]  ;;  %v61_v14 = vld [vmem:[%s193_s2 + $0x30] sm:$0xff]  ;;  %v60_v15 = vld [vmem:[%s193_s2 + $0x28] sm:$0xff] }
   0x6   :  { %40 = vmatpush.msra.mxu0 %v19_v3  ;;  %v63_v12 = vld [vmem:[%s193_s2 + $0x40] sm:$0xff]  ;;  %v58_v17 = vld [vmem:[%s193_s2 + $0x18] sm:$0xff]  ;;  %v57_v18 = vld [vmem:[%s193_s2 + $0x10] sm:$0xff] }
   0x7   :  { %74 = vmatpush.msra.mxu1 %v68_v5  ;;  %v59_v16 = vld [vmem:[%s193_s2 + $0x20] sm:$0xff]  ;;  %v56_v19 = vld [vmem:[%s193_s2 + $0x8] sm:$0xff] }
   0x8   :  { %41 = vmatpush.msra.mxu0 %v18_v6  ;;  %v55_v20 = vld [vmem:[%s193_s2] sm:$0xff] }
   0x9   :  { %97 = vmatmul.msk.f32.vlgmr.msra.gmra.mxu0 %vm22_vm0, %v17_v7  ;;  %75 = vmatpush.msra.mxu1 %v67_v8  ;;  %v71_v30 = vld [vmem:[%s195_s3] sm:$0x1] }
   0xb   :  { %76 = vmatpush.msra.mxu1 %v66_v9 }
   0xd   :  { %77 = vmatpush.msra.mxu1 %v65_v10 }
   0xf   :  { %78 = vmatpush.msra.mxu1 %v64_v11 }
  0x11   :  { %79 = vmatpush.msra.mxu1 %v63_v12 }
  0x13   :  { %80 = vmatpush.msra.mxu1 %v62_v13 }
  0x15   :  { %81 = vmatpush.msra.mxu1 %v61_v14 }
  0x17   :  { %82 = vmatpush.msra.mxu1 %v60_v15 }
  0x19   :  { %83 = vmatpush.msra.mxu1 %v59_v16 }
  0x1b   :  { %84 = vmatpush.msra.mxu1 %v58_v17 }
  0x1d   :  { %85 = vmatpush.msra.mxu1 %v57_v18 }
  0x1f   :  { %86 = vmatpush.msra.mxu1 %v56_v19 }
  0x21   :  { %87 = vmatpush.msra.mxu1 %v55_v20 }
  0x86   :  { %v43_v21 = vpop.f32.mrf.mxu0 }
  0x87   :  { %v46_v22 = vrot.slane %v43_v21, 4 }
  0x89   :  { %v47_v23 = vmax.f32 %v43_v21, %v46_v22 }
  0x8b   :  { %v48_v24 = vrot.slane %v47_v23, 2 }
  0x8d   :  { %v49_v25 = vmax.f32 %v47_v23, %v48_v24 }
  0x8f   :  { %v50_v26 = vrot.slane %v49_v25, 1 }
  0x91   :  { %v51_v27 = vmax.f32 %v49_v25, %v50_v26 }
  0x93   :  { %vm52_vm1 = vcmp.gt.f32.partialorder %v51_v27, 0.0  ;;  %v53_v28 = vmul.f32 -0.1, %v51_v27 }
  0x95   :  { %v54_v29 = vsel %vm52_vm1, %v51_v27, %v53_v28 }
  0x96   :  { %88 = vmatmul.f32.vlgmr.msra.gmra.mxu1 %v54_v29 }
 0x113   :  { %v89_v31 = vpop.f32.mrf.mxu1 }
 0x114   :  { %v90_v32 = vadd.f32 %v89_v31, %v71_v30 }
 0x116   :  { %92 = vst [vmem:[%s196_s4] sm:$0x1] %v90_v32 }

</bundles_post_ra>
